<compile_context>
chip_gen: v6e
topology: v6e:2x2x1
jax: 0.10.0
libtpu: 0.0.40
codegen_flags: <defaults>
</compile_context>

<pallas_src>
import jax
import jax.numpy as jnp
from jax.experimental import pallas as pl
from jax.experimental.pallas import tpu as pltpu

OUT_PAD = 8  # classes padded 3 -> 8 (sublane multiple); kept narrow to minimize HBM writeback


def _round_up(n, m):
    return ((n + m - 1) // m) * m


def mlp_kernel(x_ref, w1_ref, b1_ref, w2_ref, b2_ref, out_ref):
    # In-kernel cast f32 -> bf16 (VPU, hidden under DMA); hidden layer (TB,17)@(17,32) -> f32 acc.
    x_bf16 = x_ref[...].astype(jnp.bfloat16)
    h = jnp.dot(x_bf16, w1_ref[...], preferred_element_type=jnp.float32)
    h = jnp.maximum(h + b1_ref[...], 0.0)
    # TODO(synk): nn.Dropout(0.2) is identity in eval mode; training-mode dropout not implemented.
    # Output layer: (TB,32)bf16 @ (32,8)bf16 (classes zero-padded to 8) -> f32 logits.
    o = jnp.dot(h.astype(jnp.bfloat16), w2_ref[...], preferred_element_type=jnp.float32)
    out_ref[...] = (o + b2_ref[...]).astype(out_ref.dtype)


def gesture_classifier_forward(x, w1, b1, w2, b2, tile_b=16384):
    """x: (B, 17) f32; w1: (32, 17); b1: (32,); w2: (3, 32); b2: (3,). Returns (B, 3) f32 logits."""
    B, F = x.shape
    H = w1.shape[0]
    num_classes = w2.shape[0]

    # --- wrapper-side layout / dtype prep (weights only — they are tiny) ------------------------
    # Pre-transpose weights to (in, out) so the kernel does plain x @ W (no in-kernel transpose).
    w1_t = jnp.transpose(w1).astype(jnp.bfloat16)                      # (17, 32) bf16
    w2_t = jnp.zeros((H, OUT_PAD), jnp.float32).at[:, :num_classes].set(
        jnp.transpose(w2)).astype(jnp.bfloat16)                        # (32, 8) bf16, zero-padded
    b1_r = b1.reshape(1, H).astype(jnp.float32)                        # (1, 32) f32
    b2_r = jnp.zeros((1, OUT_PAD), jnp.float32).at[:, :num_classes].set(
        b2.reshape(1, num_classes))                                    # (1, 8)  f32, zero-padded

    # Batch tiling: multiple of 16 (bf16 sublane packing). Only pad B when it isn't already a
    # whole number of tiles (avoids an extra HBM pass over x in the common aligned case).
    tile_b = min(tile_b, _round_up(B, 16))
    tile_b = _round_up(tile_b, 16)
    B_pad = _round_up(B, tile_b)
    x_p = x if B_pad == B else jnp.pad(x, ((0, B_pad - B), (0, 0)))    # (B_pad, 17) f32

    grid = (B_pad // tile_b,)

    out_padded = pl.pallas_call(
        mlp_kernel,
        out_shape=jax.ShapeDtypeStruct((B_pad, OUT_PAD), jnp.float32),
        grid=grid,
        in_specs=[
            pl.BlockSpec((tile_b, F), lambda i: (i, 0)),      # x: one batch tile per step
            pl.BlockSpec((F, H), lambda i: (0, 0)),           # w1_t: resident across steps
            pl.BlockSpec((1, H), lambda i: (0, 0)),           # b1
            pl.BlockSpec((H, OUT_PAD), lambda i: (0, 0)),     # w2_t (class-padded to 8)
            pl.BlockSpec((1, OUT_PAD), lambda i: (0, 0)),     # b2  (class-padded to 8)
        ],
        out_specs=pl.BlockSpec((tile_b, OUT_PAD), lambda i: (i, 0)),
        compiler_params=pltpu.CompilerParams(
            dimension_semantics=("parallel",),
            vmem_limit_bytes=48 << 20),   # fits double-buffered f32 x-tile + f32 out-tile
    )(x_p, w1_t, b1_r, w2_t, b2_r)

    # Slice away batch padding and class padding.
    return out_padded[:B, :num_classes]


def _reference(x, w1, b1, w2, b2):
    h = jnp.maximum(x @ w1.T + b1, 0.0)
    return h @ w2.T + b2


if __name__ == "__main__":
    key = jax.random.PRNGKey(0)
    k_x, k_w1, k_b1, k_w2, k_b2 = jax.random.split(key, 5)

    B, IN, HID, NCLS = 8, 17, 32, 3

    # Deterministic parameter init (PyTorch Linear-style uniform bounds).
    bound1 = 1.0 / (IN ** 0.5)
    bound2 = 1.0 / (HID ** 0.5)
    w1 = jax.random.uniform(k_w1, (HID, IN), jnp.float32, -bound1, bound1)
    b1 = jax.random.uniform(k_b1, (HID,), jnp.float32, -bound1, bound1)
    w2 = jax.random.uniform(k_w2, (NCLS, HID), jnp.float32, -bound2, bound2)
    b2 = jax.random.uniform(k_b2, (NCLS,), jnp.float32, -bound2, bound2)

    x = jax.random.normal(k_x, (B, IN), jnp.float32)

    out = gesture_classifier_forward(x, w1, b1, w2, b2)
    out = jax.block_until_ready(out)

    ref = _reference(x, w1, b1, w2, b2)
    assert out.shape == (B, NCLS)
    # bf16 matmul inputs / f32 accumulation -> allow bf16-level tolerance vs the f32 reference.
    assert jnp.allclose(out, ref, atol=3e-2, rtol=3e-2), float(jnp.max(jnp.abs(out - ref)))

    print("KERNEL_OK")
</pallas_src>

<mosaic_0001>
module attributes {stable_mosaic.version = 11 : i64} {
  func.func @mlp_kernel(%arg0: i32, %arg1: memref<16x17xf32, #tpu.memory_space<vmem>>, %arg2: memref<17x32xbf16, #tpu.memory_space<vmem>>, %arg3: memref<1x32xf32, #tpu.memory_space<vmem>>, %arg4: memref<32x8xbf16, #tpu.memory_space<vmem>>, %arg5: memref<1x8xf32, #tpu.memory_space<vmem>>, %arg6: memref<16x8xf32, #tpu.memory_space<vmem>>) attributes {dimension_semantics = [#tpu.dimension_semantics<parallel>], iteration_bounds = array<i64: 1>, scalar_prefetch = 0 : i64, scratch_operands = 0 : i64, tpu.core_type = #tpu.core_type<tc>, window_params = [{transform_indices = @transform_0, window_bounds = array<i64: 16, 17>}, {pipeline_mode = #tpu.pipeline_mode<synchronous>, transform_indices = @transform_1, window_bounds = array<i64: 17, 32>}, {pipeline_mode = #tpu.pipeline_mode<synchronous>, transform_indices = @transform_2, window_bounds = array<i64: 1, 32>}, {pipeline_mode = #tpu.pipeline_mode<synchronous>, transform_indices = @transform_3, window_bounds = array<i64: 32, 8>}, {pipeline_mode = #tpu.pipeline_mode<synchronous>, transform_indices = @transform_4, window_bounds = array<i64: 1, 8>}, {transform_indices = @transform_5, window_bounds = array<i64: 16, 8>}]} {
    %c0 = arith.constant 0 : index
    %c0_0 = arith.constant 0 : index
    %0 = vector.load %arg1[%c0, %c0_0] : memref<16x17xf32, #tpu.memory_space<vmem>>, vector<16x17xf32>
    %1 = arith.truncf %0 : vector<16x17xf32> to vector<16x17xbf16>
    %c0_1 = arith.constant 0 : index
    %c0_2 = arith.constant 0 : index
    %2 = vector.load %arg2[%c0_1, %c0_2] : memref<17x32xbf16, #tpu.memory_space<vmem>>, vector<17x32xbf16>
    %cst = arith.constant dense<0.000000e+00> : vector<16x32xf32>
    %3 = tpu.matmul %1, %2, %cst {dimension_numbers = #tpu.dot_dimension_numbers<[1], [0], [0], [1], [0, 0, 1, 1], [], []>} : vector<16x17xbf16>, vector<17x32xbf16>, vector<16x32xf32> -> vector<16x32xf32>
    %c0_3 = arith.constant 0 : index
    %c0_4 = arith.constant 0 : index
    %4 = vector.load %arg3[%c0_3, %c0_4] : memref<1x32xf32, #tpu.memory_space<vmem>>, vector<1x32xf32>
    %5 = vector.broadcast %4 : vector<1x32xf32> to vector<16x32xf32>
    %6 = arith.addf %3, %5 : vector<16x32xf32>
    %cst_5 = arith.constant 0.000000e+00 : f32
    %7 = vector.broadcast %cst_5 : f32 to vector<16x32xf32>
    %8 = arith.maximumf %6, %7 : vector<16x32xf32>
    %9 = arith.truncf %8 : vector<16x32xf32> to vector<16x32xbf16>
    %c0_6 = arith.constant 0 : index
    %c0_7 = arith.constant 0 : index
    %10 = vector.load %arg4[%c0_6, %c0_7] : memref<32x8xbf16, #tpu.memory_space<vmem>>, vector<32x8xbf16>
    %cst_8 = arith.constant dense<0.000000e+00> : vector<16x8xf32>
    %11 = tpu.matmul %9, %10, %cst_8 {dimension_numbers = #tpu.dot_dimension_numbers<[1], [0], [0], [1], [0, 0, 1, 1], [], []>} : vector<16x32xbf16>, vector<32x8xbf16>, vector<16x8xf32> -> vector<16x8xf32>
    %c0_9 = arith.constant 0 : index
    %c0_10 = arith.constant 0 : index
    %12 = vector.load %arg5[%c0_9, %c0_10] : memref<1x8xf32, #tpu.memory_space<vmem>>, vector<1x8xf32>
    %13 = vector.broadcast %12 : vector<1x8xf32> to vector<16x8xf32>
    %14 = arith.addf %11, %13 : vector<16x8xf32>
    %c0_11 = arith.constant 0 : index
    %c0_12 = arith.constant 0 : index
    %15 = vector.load %arg6[%c0_11, %c0_12] : memref<16x8xf32, #tpu.memory_space<vmem>>, vector<16x8xf32>
    tpu.vector_store %arg6[%c0_11, %c0_12], %14 {strides = array<i32>} : memref<16x8xf32, #tpu.memory_space<vmem>>, vector<16x8xf32>,
    return
  }
  func.func @transform_0(%arg0: i32) -> (i32, i32) {
    %c0_i32 = arith.constant 0 : i32
    %c0_i32_0 = arith.constant 0 : i32
    return %arg0, %c0_i32 : i32, i32
  }
  func.func @transform_1(%arg0: i32) -> (i32, i32) {
    %c0_i32 = arith.constant 0 : i32
    %c0_i32_0 = arith.constant 0 : i32
    %c0_i32_1 = arith.constant 0 : i32
    return %c0_i32, %c0_i32_0 : i32, i32
  }
  func.func @transform_2(%arg0: i32) -> (i32, i32) {
    %c0_i32 = arith.constant 0 : i32
    %c0_i32_0 = arith.constant 0 : i32
    %c0_i32_1 = arith.constant 0 : i32
    return %c0_i32, %c0_i32_0 : i32, i32
  }
  func.func @transform_3(%arg0: i32) -> (i32, i32) {
    %c0_i32 = arith.constant 0 : i32
    %c0_i32_0 = arith.constant 0 : i32
    %c0_i32_1 = arith.constant 0 : i32
    return %c0_i32, %c0_i32_0 : i32, i32
  }
  func.func @transform_4(%arg0: i32) -> (i32, i32) {
    %c0_i32 = arith.constant 0 : i32
    %c0_i32_0 = arith.constant 0 : i32
    %c0_i32_1 = arith.constant 0 : i32
    return %c0_i32, %c0_i32_0 : i32, i32
  }
  func.func @transform_5(%arg0: i32) -> (i32, i32) {
    %c0_i32 = arith.constant 0 : i32
    %c0_i32_0 = arith.constant 0 : i32
    return %arg0, %c0_i32 : i32, i32
  }
}

</mosaic_0001>

<bundles_post_ra>
// kernel: tpu_custom_call.1
= control target key start
LH: loop header
LB: loop body
LE: loop exit
PB: predicated region body
PF: predicated region fallthrough
CT: control target
= control target key end

     0   :  { %10 = vsyncpa [#allocation3], 0  ;;  %s249_s18 = smov [#allocation2]   ;;  %s312_s0 = inlined_call_operand.vmem [shape: f32[16,17], index: 0, kind: input, shape index: {}]   ;;  %s313_s1 = inlined_call_operand.hbm [shape: bf16[17,32], index: 1, kind: input, shape index: {}]   ;;  %s314_s2 = inlined_call_operand.vmem [shape: f32[1,32], index: 2, kind: input, shape index: {}]   ;;  %s315_s3 = inlined_call_operand.vmem [shape: bf16[32,8], index: 3, kind: input, shape index: {}]   ;;  %s316_s4 = inlined_call_operand.vmem [shape: f32[1,8], index: 4, kind: input, shape index: {}]   ;;  %s317_s5 = inlined_call_operand.vmem [shape: f32[16,8], index: 5, kind: output, shape index: {}]  }
   0x1   :  { %s18_s19 = sshll.u32 %s249_s18, 4  ;;  %s19_s19 = int_to_ptr.vmem [resolvable:$true] %s18_s19 }
   0x2   :  { %s235_s20 = scalar_lea.vmem %s19_s19, 192  ;;  %p240_p1 = scmp.lt.s32.totalorder %s19_s19, %s19_s19 }
   0x3   :  { %p236_p0 = scmp.ne.s32.totalorder %s19_s19, %s235_s20  ;;  %p241_p2 = scmp.lt.s32.totalorder %s235_s20, %s235_s20 }
   0x5   :  { %p242_p3 = por %p241_p2, %p240_p1 }
   0x7   :  { %p243_p4 = pnand %p242_p3, %p236_p0 }
   0x9   :  { %246 = shalt.err (!%p243_p4)
}
   0xa   :  { %s250_s21 = smov 64   ;;  %s251_s22 = smov 4  }
   0xb   :  { %24 = dma.hbm_to_vmem [thread:$0]  %s313_s1, 192, %s19_s19, [#allocation3], %s250_s21, %s250_s21, %s251_s22  }
   0xc   :  { %247 = dma.done.wait [#allocation3], 192  }
   0xd   :  { %248 = vsyncadd [#allocation3], 4294967104  ;;  %v252_v0 = vmov 0.0   ;;  %vm253_vm0 = vmmov 0   ;;  %vm61_vm1 = vcmask 1040384   ;;  %v254_v1 = vmov 0  }
   0xe   :  { %201 = vmatprep.subr.bf16.mxu0 %v252_v0  ;;  %205 = vmatprep.mubr.msk.bf16.mxu0 %vm253_vm0, %v252_v0  ;;  %v63_v2 = vsel %vm61_vm1, 65535, %v254_v1  ;;  %v223_v3 = vld [vmem:[#allocation2 + $0x8] ss:$0 sps:$4 sm:$0x11]   ;;  %v224_v5 = vld [vmem:[#allocation2] sm:$0xff]   ;;  %vm57_vm2 = vcmask 138240  }
   0xf   :  { %209 = vmatprep.subr.bf16.mxu1 %v252_v0  ;;  %213 = vmatprep.mubr.msk.bf16.mxu1 %vm253_vm0, %v252_v0  ;;  %v65_v4 = vand.u32 %v223_v3, %v63_v2  ;;  %v35_v6 = vld [vmem:[%s312_s0] sm:$0xff]  ;;  %v36_v7 = vld [vmem:[%s312_s0 + $0x8] sm:$0xff]  ;;  %vm134_vm3 = vcmask 261120   ;;  %vm179_vm4 = vcmask 64512  }
  0x10   :  { %v37_v8 = vpack.c.bf16 %v36_v7, %v35_v6  ;;  %v225_v9 = vld [vmem:[%s315_s3 + $0x8] sm:$0xff]   ;;  %v226_v10 = vld [vmem:[%s315_s3] sm:$0xff]  }
  0x11   :  { %202 = vmatpush3.bf16.msra.mxu0 %v65_v4  ;;  %210 = vmatpush3.bf16.msra.mxu1 %v225_v9  ;;  %v187_v11 = vld [vmem:[%s314_s2] ss:$0 sm:$0xff] }
  0x12   :  { %203 = vmatprep.subr.bf16.mxu0 %v252_v0  ;;  %211 = vmatprep.subr.bf16.mxu1 %v252_v0  ;;  %v191_v21 = vld [vmem:[%s316_s4] ss:$0 sm:$0xff] }
  0x15   :  { %204 = vmatpush3.bf16.msra.mxu0 %v224_v5  ;;  %212 = vmatpush3.bf16.msra.mxu1 %v226_v10 }
  0x18   :  { %206 = vmatmul.mubr.msk.bf16.vlgmr.msra.gmra.mxu0 %vm57_vm2, %v37_v8 }
  0xd8   :  { %v101_v12 = vpop.f32.mrf.mxu0 }
  0xd9   :  { %v102_v14 = vadd.f32 %v187_v11, %v101_v12 }
  0xda   :  { %v207_v13 = vpop.f32.mrf.mxu0 }
  0xdb   :  { %v108_v18 = vmax.f32 %v102_v14, 0.0 }
  0xdc   :  { %v104_v15 = vpop.f32.mrf.mxu0 }
  0xdd   :  { %v105_v16 = vadd.f32 %v187_v11, %v104_v15 }
  0xde   :  { %v208_v17 = vpop.f32.mrf.mxu0 }
  0xdf   :  { %v109_v19 = vmax.f32 %v105_v16, 0.0 }
  0xe1   :  { %v110_v20 = vpack.c.bf16 %v109_v19, %v108_v18 }
  0xe3   :  { %214 = vmatmul.mubr.msk.bf16.vlgmr.msra.gmra.mxu1 %vm134_vm3, %v110_v20 }
 0x1a3   :  { %v172_v22 = vpop.f32.mrf.mxu1 }
 0x1a4   :  { %v173_v23 = vadd.f32 %v191_v21, %v172_v22 }
 0x1a5   :  { %v215_v24 = vpop.f32.mrf.mxu1 }
 0x1a6   :  { %180 = vst.msk [vmem:[%s317_s5] sm:$0xff] %vm179_vm4, %v173_v23 }
 0x1a7   :  { %v175_v25 = vpop.f32.mrf.mxu1 }
 0x1a8   :  { %v176_v26 = vadd.f32 %v191_v21, %v175_v25 }
 0x1a9   :  { %v216_v27 = vpop.f32.mrf.mxu1 }
 0x1aa   :  { %181 = vst.msk [vmem:[%s317_s5 + $0x8] sm:$0xff] %vm179_vm4, %v176_v26 }
 0x1ab   :  { %186 = vsyncpa [#allocation3], 1 }

</bundles_post_ra>
